<compile_context>
chip_gen: v6e
topology: v6e:2x2x1
jax: 0.10.0
libtpu: 0.0.40
codegen_flags: <defaults>
</compile_context>

<pallas_src>
import functools
import math
import warnings

import jax
import jax.numpy as jnp
from jax.experimental import pallas as pl
from jax.experimental.pallas import tpu as pltpu


def _bias_add_kernel(x_ref, b_ref, o_ref):
    # x_ref: (tile_nc, tile_hw); b_ref: (1, tile_hw) -> broadcast over sublanes.
    # Add promotes to the wider dtype (PyTorch-style), store in output dtype.
    o_ref[...] = (x_ref[...] + b_ref[...]).astype(o_ref.dtype)


def _cdiv(a, b):
    return -(-a // b)


def _ceil_to(v, m):
    return _cdiv(v, m) * m


@functools.lru_cache(maxsize=1)
def _tpu_profile():
    """Returns (physical VMEM bytes, multi-TensorCore chip?) with safe fallbacks."""
    vmem = 128 * 1024 * 1024
    multicore = False
    try:
        info = pltpu.get_tpu_info()
        vmem = int(getattr(info, "vmem_capacity_bytes", vmem))
        for attr in ("num_cores", "num_tensorcores", "tensorcores_per_chip",
                     "cores_per_chip"):
            v = getattr(info, attr, None)
            if isinstance(v, int) and v > 1:
                multicore = True
        # v7x exposes 64 MiB VMEM per TensorCore and has 2 TCs per chip.
        if vmem <= 64 * 1024 * 1024:
            multicore = True
    except Exception:
        # Query unavailable -> conservative single-core / 128 MiB defaults.
        pass
    return vmem, multicore


def _lane_fold_factor(hw):
    """Rows folded into the lane dim so the fused last dim becomes a multiple of 128."""
    if hw % 128 == 0:
        return 1
    return 128 // math.gcd(hw, 128)


def _choose_tiles(nc, hw, x_isz, o_isz, vmem_limit, multicore):
    """Pick (tile_nc, tile_hw) from a generation-aware VMEM budget."""
    sub = max(8, 32 // x_isz)  # sublane packing multiple for x's dtype
    # Elements per tile such that double-buffered x+out stay within ~40% of the
    # scoped limit, and one x tile stays <= ~8 MiB (big enough that the fixed
    # per-step overhead is negligible even at v7x HBM bandwidth).
    elem_budget = min((8 << 20) // x_isz,
                      (vmem_limit * 2 // 5) // (x_isz + o_isz))
    elem_budget = max(elem_budget, sub * 128)

    if hw * sub > elem_budget and hw > 128:
        # Even `sub` rows bust the budget (huge feature map): add a lane-dense
        # grid axis over HW (tile_hw a multiple of 128).
        tile_hw = min(hw, max(128, ((elem_budget // sub) // 128) * 128))
        tile_nc = nc if nc <= sub else sub
        return tile_nc, tile_hw

    tile_hw = hw
    rows = max(sub, ((elem_budget // hw) // sub) * sub)
    if nc > 2 * sub:
        # Keep >= 2 grid steps when there is enough work so input/output DMAs
        # of adjacent steps overlap (single-TC parts need no more than that).
        rows = min(rows, _ceil_to(_cdiv(nc, 2), sub))
    if multicore and rows < nc:
        # Prefer an even number of steps so the core-parallel split is balanced.
        steps = _cdiv(nc, rows)
        if steps % 2:
            alt = max(sub, _ceil_to(_cdiv(nc, steps + 1), sub))
            if alt < nc and _cdiv(nc, alt) % 2 == 0:
                rows = alt
    if rows >= nc:
        return nc, tile_hw  # full-extent block is always layout-legal
    return rows, tile_hw


def _bias_add_2d(x2d, b_row, out_dtype):
    """Lane-dense (NC, HW) + (1, HW) broadcast add via pallas_call."""
    NC, HW = x2d.shape
    x_isz = jnp.dtype(x2d.dtype).itemsize
    o_isz = jnp.dtype(out_dtype).itemsize

    vmem_phys, multicore = _tpu_profile()
    # 48 MiB scoped limit on 64-MiB-VMEM parts (v7x), 64 MiB on 128-MiB parts.
    vmem_limit = (48 << 20) if vmem_phys <= (64 << 20) else (64 << 20)
    vmem_limit = max(16 << 20, min(vmem_limit, vmem_phys))

    tile_nc, tile_hw = _choose_tiles(NC, HW, x_isz, o_isz, vmem_limit, multicore)
    nc_steps = pl.cdiv(NC, tile_nc)
    hw_steps = pl.cdiv(HW, tile_hw)
    grid = (nc_steps, hw_steps)

    # Only CORE_PARALLEL actually shards a grid axis across v7x's two
    # TensorCores; plain "parallel" vs "arbitrary" barely changes codegen.
    par = "parallel"
    nc_sem = par
    if multicore and nc_steps >= 2 and nc_steps % 2 == 0:
        nc_sem = getattr(pltpu, "CORE_PARALLEL", par)
    dims = (nc_sem, par)

    # Optional deeper input prefetch on v7x when steady-state steps are short.
    x_spec_kwargs = {}
    x_tile_bytes = tile_nc * tile_hw * x_isz
    if multicore and nc_steps * hw_steps >= 4 and x_tile_bytes <= (4 << 20):
        x_spec_kwargs["pipeline_mode"] = pl.Buffered(3)

    in_specs = [
        pl.BlockSpec((tile_nc, tile_hw), lambda i, j: (i, j), **x_spec_kwargs),
        # Bias block index is constant along the NC axis; in the common
        # hw_steps==1 case consecutive block indices are identical so the
        # pipeline keeps the bias resident instead of re-DMA'ing it per step.
        pl.BlockSpec((1, tile_hw), lambda i, j: (0, j)),
    ]
    out_spec = pl.BlockSpec((tile_nc, tile_hw), lambda i, j: (i, j))

    # Alias x's buffer to the output (true in-place when the caller donates x
    # at the jit boundary); only legal when dtypes match.
    alias = {0: 0} if x2d.dtype == jnp.dtype(out_dtype) else {}

    return pl.pallas_call(
        _bias_add_kernel,
        out_shape=jax.ShapeDtypeStruct((NC, HW), out_dtype),
        grid_spec=pltpu.PrefetchScalarGridSpec(
            num_scalar_prefetch=0,
            grid=grid,
            in_specs=in_specs,
            out_specs=out_spec,
        ),
        input_output_aliases=alias,
        compiler_params=pltpu.CompilerParams(
            dimension_semantics=dims,
            vmem_limit_bytes=vmem_limit,
        ),
    )(x2d, b_row)


def learnable_bias4img(x, bias):
    """x: (N, C, H, W) NCHW, bias: (H*W,). Returns x + bias-as-(W,H) broadcast.

    NOTE: intended to be used as jax.jit(learnable_bias4img, donate_argnums=0)
    so the in-kernel output alias of x is a real in-place update (otherwise
    XLA inserts a defensive copy of x and the alias buys nothing). The caller
    must not reuse x after a donated call.
    """
    N, C, H, W = x.shape
    assert bias.shape == (H * W,), "out_chn must equal H*W"
    assert H == W, "PyTorch expand_as of a (W,H) bias onto (...,H,W) needs H == W"

    # Match PyTorch type promotion (e.g. bf16 x + f32 bias -> f32 output).
    out_dtype = jnp.result_type(x.dtype, bias.dtype)

    # With H == W, reshape(W, H) flattened row-major == the original 1-D bias.
    b_row = bias.reshape(1, H * W)
    x_flat = x.reshape(N * C, H * W)
    NC, HW = x_flat.shape

    k = _lane_fold_factor(HW)
    if k > 1 and NC >= k:
        # Small HW (not a multiple of 128): fold k rows into the lane dim so
        # the main path stays lane-dense; finish the <k leftover rows with a
        # tiny plain-JAX broadcast add.
        main_rows = (NC // k) * k
        x_main = x_flat[:main_rows].reshape(main_rows // k, k * HW)
        b_main = jnp.tile(b_row, (1, k))
        out_main = _bias_add_2d(x_main, b_main, out_dtype).reshape(main_rows, HW)
        if main_rows < NC:
            tail = (x_flat[main_rows:] + b_row).astype(out_dtype)
            out_flat = jnp.concatenate([out_main, tail], axis=0)
        else:
            out_flat = out_main
    else:
        # Either HW is already a multiple of 128 (lane-dense as-is) or the
        # input is a tiny degenerate case handled as one full-extent block.
        out_flat = _bias_add_2d(x_flat, b_row, out_dtype)

    return out_flat.reshape(N, C, H, W)


if __name__ == "__main__":
    key = jax.random.PRNGKey(0)
    kx, kb = jax.random.split(key)

    N, C, H, W = 2, 4, 16, 16           # small NCHW input, square spatial
    out_chn = H * W                      # module __init__: bias = zeros(out_chn)

    x = jax.random.normal(kx, (N, C, H, W), dtype=jnp.float32)
    # Parameter initializes to zeros; use a deterministic nonzero value so the
    # broadcast path is actually exercised.
    bias = jax.random.normal(kb, (out_chn,), dtype=jnp.float32) * 0.1

    # Reference (pure JAX) matching PyTorch semantics — computed and realized
    # BEFORE the kernel call because x's buffer is donated below.
    ref = jax.block_until_ready(x + jnp.broadcast_to(bias.reshape(W, H), x.shape))

    # Donating x makes the pallas-level alias a genuine in-place add. If XLA
    # ever declines the alias it only emits a benign perf warning; silence it.
    warnings.filterwarnings("ignore", message="Some donated buffers were not usable")
    fwd = jax.jit(learnable_bias4img, donate_argnums=(0,))
    out = jax.block_until_ready(fwd(x, bias))  # x must not be used after this

    assert out.shape == ref.shape and out.dtype == ref.dtype
    assert jnp.allclose(out, ref, atol=1e-6, rtol=1e-6)

    print("KERNEL_OK")
</pallas_src>

<mosaic_0001>
module attributes {stable_mosaic.version = 11 : i64} {
  func.func @_bias_add_kernel(%arg0: i32, %arg1: i32, %arg2: memref<8x256xf32, #tpu.memory_space<vmem>>, %arg3: memref<1x256xf32, #tpu.memory_space<vmem>>, %arg4: memref<8x256xf32, #tpu.memory_space<vmem>>) attributes {dimension_semantics = [#tpu.dimension_semantics<parallel>, #tpu.dimension_semantics<parallel>], iteration_bounds = array<i64: 1, 1>, scalar_prefetch = 0 : i64, scratch_operands = 0 : i64, tpu.core_type = #tpu.core_type<tc>, window_params = [{transform_indices = @transform_0, window_bounds = array<i64: 8, 256>}, {transform_indices = @transform_1, window_bounds = array<i64: 1, 256>}, {transform_indices = @transform_2, window_bounds = array<i64: 8, 256>}]} {
    %c0 = arith.constant 0 : index
    %c0_0 = arith.constant 0 : index
    %0 = vector.load %arg2[%c0, %c0_0] : memref<8x256xf32, #tpu.memory_space<vmem>>, vector<8x256xf32>
    %c0_1 = arith.constant 0 : index
    %c0_2 = arith.constant 0 : index
    %1 = vector.load %arg3[%c0_1, %c0_2] : memref<1x256xf32, #tpu.memory_space<vmem>>, vector<1x256xf32>
    %2 = vector.broadcast %1 : vector<1x256xf32> to vector<8x256xf32>
    %3 = arith.addf %0, %2 : vector<8x256xf32>
    %c0_3 = arith.constant 0 : index
    %c0_4 = arith.constant 0 : index
    %4 = vector.load %arg4[%c0_3, %c0_4] : memref<8x256xf32, #tpu.memory_space<vmem>>, vector<8x256xf32>
    tpu.vector_store %arg4[%c0_3, %c0_4], %3 {strides = array<i32>} : memref<8x256xf32, #tpu.memory_space<vmem>>, vector<8x256xf32>,
    return
  }
  func.func @transform_0(%arg0: i32, %arg1: i32) -> (i32, i32) {
    %c0_i32 = arith.constant 0 : i32
    return %arg0, %arg1 : i32, i32
  }
  func.func @transform_1(%arg0: i32, %arg1: i32) -> (i32, i32) {
    %c0_i32 = arith.constant 0 : i32
    %c0_i32_0 = arith.constant 0 : i32
    return %c0_i32, %arg1 : i32, i32
  }
  func.func @transform_2(%arg0: i32, %arg1: i32) -> (i32, i32) {
    %c0_i32 = arith.constant 0 : i32
    return %arg0, %arg1 : i32, i32
  }
}

</mosaic_0001>

<bundles_post_ra>
// kernel: learnable_bias4img.1
= control target key start
LH: loop header
LB: loop body
LE: loop exit
PB: predicated region body
PF: predicated region fallthrough
CT: control target
= control target key end

     0   :  { %v15_v0 = vlaneseq  ;;  %s63_s1 = inlined_call_operand.vmem [shape: f32[1,256], index: 1, kind: input, shape index: {}]   ;;  %s64_s0 = inlined_call_operand.vmem [shape: f32[8,256], index: 0, kind: input, shape index: {}, may-alias: {0,2}]   ;;  %s65_s2 = inlined_call_operand.vmem [shape: f32[8,256], index: 2, kind: output, shape index: {}, may-alias: {0,2}]  }
   0x1   :  { %v13_v2 = vld [vmem:[%s63_s1] sm:$0x3]  ;;  %v12_v6 = vld [vmem:[%s64_s0 + $0x8] sm:$0xff] }
   0x2   :  { %v16_v1 = vshrl.u32 %v15_v0, 7  ;;  %v11_v5 = vld [vmem:[%s64_s0] sm:$0xff] }
   0x4   :  { %v17_v3 = vsub.s32 0, %v16_v1  ;;  %v21_v4 = vsub.s32 1, %v16_v1 }
   0x6   :  { %v18_v7 = vrot.slane %v13_v2, %v17_v3  ;;  %v22_v8 = vrot.slane %v13_v2, %v21_v4 }
   0x8   :  { %v25_v9 = vadd.f32 %v18_v7, %v11_v5  ;;  %v26_v10 = vadd.f32 %v22_v8, %v12_v6 }
   0xa   :  { %27 = vst [vmem:[%s65_s2] sm:$0xff] %v25_v9  ;;  %28 = vst [vmem:[%s65_s2 + $0x8] sm:$0xff] %v26_v10 }

</bundles_post_ra>
